<compile_context>
chip_gen: v7x
topology: tpu7x:2x2x1
jax: 0.10.0
libtpu: 0.0.40
codegen_flags: <defaults>
</compile_context>

<pallas_src>
import jax
import jax.numpy as jnp
from jax.experimental import pallas as pl
from jax.experimental.pallas import tpu as pltpu

K1 = 784          # fc1 contraction (natural, un-padded)
H1 = 256
H2 = 128
OUT_PAD = 128     # 10 logits padded to one full lane group
B_TILE_MAX = 512  # batch tile cap when batch is large (multiple of 256)


def _cdiv(a, b):
    return -(-a // b)


def _round_up(n, m):
    return ((n + m - 1) // m) * m


def mlp_kernel(x_ref, w1_ref, w2_ref, w3_ref, b_ref, o_ref):
    # Biases live in one concatenated (1, 512) f32 row: [b1 | b2 | b3_pad].
    b1 = b_ref[:, 0:H1]
    b2 = b_ref[:, H1:H1 + H2]
    b3 = b_ref[:, H1 + H2:H1 + H2 + OUT_PAD]

    # Activations arrive f32 straight from HBM; cast to bf16 on the VPU so the
    # wrapper never materializes a padded/cast copy.
    x = x_ref[...].astype(jnp.bfloat16)

    # fc1 + relu (bf16 MXU inputs, f32 accumulate)
    h1 = jnp.dot(x, w1_ref[...], preferred_element_type=jnp.float32)
    h1 = jnp.maximum(h1 + b1, 0.0).astype(jnp.bfloat16)
    # fc2 + relu
    h2 = jnp.dot(h1, w2_ref[...], preferred_element_type=jnp.float32)
    h2 = jnp.maximum(h2 + b2, 0.0).astype(jnp.bfloat16)
    # fc3 (lane-dense 128-wide logits; real logits are columns 0:10)
    out = jnp.dot(h2, w3_ref[...], preferred_element_type=jnp.float32)
    o_ref[...] = (out + b3).astype(o_ref.dtype)


@jax.jit
def net_forward(x, packed_params):
    """Forward pass equivalent to PyTorch Net: x.view(-1, 784) -> 3-layer MLP."""
    w1, w2, w3, b_all = packed_params
    x2d = x.reshape(-1, K1).astype(jnp.float32)
    B = x2d.shape[0]

    # Batch tile selection:
    #  * small batch  -> single tile, rounded to 16 rows (bf16 sublane pair)
    #  * large batch  -> multiple of 256 (fills 2x256^2 MXU on v6e/v7x),
    #                    capped at 512, chosen so the grid has >= 2 steps
    #                    (engages both v7x TensorCores via "parallel").
    if B <= 256:
        TB = _round_up(B, 16)
    else:
        TB = min(B_TILE_MAX, _round_up(_cdiv(B, 2), 256))
    Bp = _cdiv(B, TB) * TB

    # Only a cheap row-pad when the batch doesn't divide the tile; no K pad,
    # no dtype-cast roundtrip through HBM.
    xp = x2d if Bp == B else jnp.pad(x2d, ((0, Bp - B), (0, 0)))

    flops = 2 * Bp * (K1 * H1 + H1 * H2 + H2 * OUT_PAD)
    bytes_accessed = (xp.size * 4 + w1.size * 2 + w2.size * 2 + w3.size * 2
                      + b_all.size * 4 + Bp * OUT_PAD * 2)

    out = pl.pallas_call(
        mlp_kernel,
        out_shape=jax.ShapeDtypeStruct((Bp, OUT_PAD), jnp.bfloat16),
        grid_spec=pltpu.PrefetchScalarGridSpec(
            num_scalar_prefetch=0,
            grid=(Bp // TB,),
            in_specs=[
                pl.BlockSpec((TB, K1), lambda i: (i, 0)),       # activations stream
                pl.BlockSpec((K1, H1), lambda i: (0, 0)),       # weights: constant
                pl.BlockSpec((H1, H2), lambda i: (0, 0)),       #   index_map ->
                pl.BlockSpec((H2, OUT_PAD), lambda i: (0, 0)),  #   fetched once
                pl.BlockSpec((1, H1 + H2 + OUT_PAD), lambda i: (0, 0)),  # biases
            ],
            out_specs=pl.BlockSpec((TB, OUT_PAD), lambda i: (i, 0)),
        ),
        compiler_params=pltpu.CompilerParams(
            dimension_semantics=("parallel",),  # shards batch tiles on v7x (2 TCs)
        ),
        cost_estimate=pl.CostEstimate(
            flops=flops, transcendentals=0, bytes_accessed=bytes_accessed),
    )(xp, w1, w2, w3, b_all)

    # Real logits are the first 10 lane columns; upcast the tiny slice to f32.
    return out[:B, :10].astype(jnp.float32)


def init_params(key):
    """Torch nn.Linear-style init; weights stored as (in, out) so kernel does x @ W."""
    k = jax.random.split(key, 6)

    def uniform_fanin(kw, kb, fan_in, fan_out):
        bound = 1.0 / jnp.sqrt(jnp.float32(fan_in))
        w = jax.random.uniform(kw, (fan_in, fan_out), jnp.float32, -bound, bound)
        b = jax.random.uniform(kb, (1, fan_out), jnp.float32, -bound, bound)
        return w, b

    w1, b1 = uniform_fanin(k[0], k[1], 784, 256)
    w2, b2 = uniform_fanin(k[2], k[3], 256, 128)
    w3, b3 = uniform_fanin(k[4], k[5], 128, 10)
    return (w1, b1, w2, b2, w3, b3)


def pack_params(params):
    """bf16 weights (MXU-friendly, lane-dense last layer) + one f32 bias row."""
    w1, b1, w2, b2, w3, b3 = params
    w1p = w1.astype(jnp.bfloat16)                                           # (784, 256)
    w2p = w2.astype(jnp.bfloat16)                                           # (256, 128)
    w3p = jnp.zeros((H2, OUT_PAD), jnp.float32).at[:, :10].set(w3).astype(jnp.bfloat16)
    b3p = jnp.zeros((1, OUT_PAD), jnp.float32).at[:, :10].set(b3)
    b_all = jnp.concatenate([b1, b2, b3p], axis=1)                          # (1, 512) f32
    return (w1p, w2p, w3p, b_all)


if __name__ == "__main__":
    key = jax.random.PRNGKey(0)
    pkey, xkey = jax.random.split(key)

    params = init_params(pkey)
    packed = pack_params(params)
    x = jax.random.normal(xkey, (8, 1, 28, 28), jnp.float32)  # MNIST-like NCHW

    out = net_forward(x, packed)
    out = jax.block_until_ready(out)
    assert out.shape == (8, 10)

    w1, b1, w2, b2, w3, b3 = params

    # bf16-matched pure-JAX reference (same quantization as the kernel).
    xb = x.reshape(-1, 784).astype(jnp.bfloat16)
    r = jnp.dot(xb, w1.astype(jnp.bfloat16), preferred_element_type=jnp.float32) + b1
    r = jnp.maximum(r, 0.0).astype(jnp.bfloat16)
    r = jnp.dot(r, w2.astype(jnp.bfloat16), preferred_element_type=jnp.float32) + b2
    r = jnp.maximum(r, 0.0).astype(jnp.bfloat16)
    r = jnp.dot(r, w3.astype(jnp.bfloat16), preferred_element_type=jnp.float32) + b3
    assert jnp.allclose(out, r, atol=2e-2, rtol=2e-2), float(jnp.max(jnp.abs(out - r)))

    # Loose check against the full-f32 reference (bf16 quantization error only).
    xf = x.reshape(-1, 784)
    rf = jnp.maximum(xf @ w1 + b1, 0.0)
    rf = jnp.maximum(rf @ w2 + b2, 0.0)
    rf = rf @ w3 + b3
    assert jnp.allclose(out, rf, atol=1e-1, rtol=1e-1), float(jnp.max(jnp.abs(out - rf)))

    print("KERNEL_OK")
</pallas_src>

<mosaic_0001>
module attributes {stable_mosaic.version = 11 : i64} {
  func.func @mlp_kernel(%arg0: i32, %arg1: memref<16x784xf32, #tpu.memory_space<vmem>>, %arg2: memref<784x256xbf16, #tpu.memory_space<vmem>>, %arg3: memref<256x128xbf16, #tpu.memory_space<vmem>>, %arg4: memref<128x128xbf16, #tpu.memory_space<vmem>>, %arg5: memref<1x512xf32, #tpu.memory_space<vmem>>, %arg6: memref<16x128xbf16, #tpu.memory_space<vmem>>) attributes {dimension_semantics = [#tpu.dimension_semantics<parallel>], iteration_bounds = array<i64: 1>, scalar_prefetch = 0 : i64, scratch_operands = 0 : i64, tpu.core_type = #tpu.core_type<tc>, window_params = [{transform_indices = @transform_0, window_bounds = array<i64: 16, 784>}, {pipeline_mode = #tpu.pipeline_mode<synchronous>, transform_indices = @transform_1, window_bounds = array<i64: 784, 256>}, {pipeline_mode = #tpu.pipeline_mode<synchronous>, transform_indices = @transform_2, window_bounds = array<i64: 256, 128>}, {pipeline_mode = #tpu.pipeline_mode<synchronous>, transform_indices = @transform_3, window_bounds = array<i64: 128, 128>}, {pipeline_mode = #tpu.pipeline_mode<synchronous>, transform_indices = @transform_4, window_bounds = array<i64: 1, 512>}, {transform_indices = @transform_5, window_bounds = array<i64: 16, 128>}]} {
    %c0 = arith.constant 0 : index
    %c0_0 = arith.constant 0 : index
    %0 = vector.load %arg5[%c0, %c0_0] : memref<1x512xf32, #tpu.memory_space<vmem>>, vector<1x256xf32>
    %c0_1 = arith.constant 0 : index
    %c256 = arith.constant 256 : index
    %1 = vector.load %arg5[%c0_1, %c256] : memref<1x512xf32, #tpu.memory_space<vmem>>, vector<1x128xf32>
    %c0_2 = arith.constant 0 : index
    %c384 = arith.constant 384 : index
    %2 = vector.load %arg5[%c0_2, %c384] : memref<1x512xf32, #tpu.memory_space<vmem>>, vector<1x128xf32>
    %c0_3 = arith.constant 0 : index
    %c0_4 = arith.constant 0 : index
    %3 = vector.load %arg1[%c0_3, %c0_4] : memref<16x784xf32, #tpu.memory_space<vmem>>, vector<16x784xf32>
    %4 = arith.truncf %3 : vector<16x784xf32> to vector<16x784xbf16>
    %c0_5 = arith.constant 0 : index
    %c0_6 = arith.constant 0 : index
    %5 = vector.load %arg2[%c0_5, %c0_6] : memref<784x256xbf16, #tpu.memory_space<vmem>>, vector<784x256xbf16>
    %cst = arith.constant dense<0.000000e+00> : vector<16x256xf32>
    %6 = tpu.matmul %4, %5, %cst {dimension_numbers = #tpu.dot_dimension_numbers<[1], [0], [0], [1], [0, 0, 1, 1], [], []>} : vector<16x784xbf16>, vector<784x256xbf16>, vector<16x256xf32> -> vector<16x256xf32>
    %7 = vector.broadcast %0 : vector<1x256xf32> to vector<16x256xf32>
    %8 = arith.addf %6, %7 : vector<16x256xf32>
    %cst_7 = arith.constant 0.000000e+00 : f32
    %9 = vector.broadcast %cst_7 : f32 to vector<16x256xf32>
    %10 = arith.maximumf %8, %9 : vector<16x256xf32>
    %11 = arith.truncf %10 : vector<16x256xf32> to vector<16x256xbf16>
    %c0_8 = arith.constant 0 : index
    %c0_9 = arith.constant 0 : index
    %12 = vector.load %arg3[%c0_8, %c0_9] : memref<256x128xbf16, #tpu.memory_space<vmem>>, vector<256x128xbf16>
    %cst_10 = arith.constant dense<0.000000e+00> : vector<16x128xf32>
    %13 = tpu.matmul %11, %12, %cst_10 {dimension_numbers = #tpu.dot_dimension_numbers<[1], [0], [0], [1], [0, 0, 1, 1], [], []>} : vector<16x256xbf16>, vector<256x128xbf16>, vector<16x128xf32> -> vector<16x128xf32>
    %14 = vector.broadcast %1 : vector<1x128xf32> to vector<16x128xf32>
    %15 = arith.addf %13, %14 : vector<16x128xf32>
    %cst_11 = arith.constant 0.000000e+00 : f32
    %16 = vector.broadcast %cst_11 : f32 to vector<16x128xf32>
    %17 = arith.maximumf %15, %16 : vector<16x128xf32>
    %18 = arith.truncf %17 : vector<16x128xf32> to vector<16x128xbf16>
    %c0_12 = arith.constant 0 : index
    %c0_13 = arith.constant 0 : index
    %19 = vector.load %arg4[%c0_12, %c0_13] : memref<128x128xbf16, #tpu.memory_space<vmem>>, vector<128x128xbf16>
    %cst_14 = arith.constant dense<0.000000e+00> : vector<16x128xf32>
    %20 = tpu.matmul %18, %19, %cst_14 {dimension_numbers = #tpu.dot_dimension_numbers<[1], [0], [0], [1], [0, 0, 1, 1], [], []>} : vector<16x128xbf16>, vector<128x128xbf16>, vector<16x128xf32> -> vector<16x128xf32>
    %21 = vector.broadcast %2 : vector<1x128xf32> to vector<16x128xf32>
    %22 = arith.addf %20, %21 : vector<16x128xf32>
    %23 = arith.truncf %22 : vector<16x128xf32> to vector<16x128xbf16>
    %c0_15 = arith.constant 0 : index
    %c0_16 = arith.constant 0 : index
    %24 = vector.load %arg6[%c0_15, %c0_16] : memref<16x128xbf16, #tpu.memory_space<vmem>>, vector<16x128xbf16>
    tpu.vector_store %arg6[%c0_15, %c0_16], %23 {strides = array<i32>} : memref<16x128xbf16, #tpu.memory_space<vmem>>, vector<16x128xbf16>,
    return
  }
  func.func @transform_0(%arg0: i32) -> (i32, i32) {
    %c0_i32 = arith.constant 0 : i32
    %c0_i32_0 = arith.constant 0 : i32
    return %arg0, %c0_i32 : i32, i32
  }
  func.func @transform_1(%arg0: i32) -> (i32, i32) {
    %c0_i32 = arith.constant 0 : i32
    %c0_i32_0 = arith.constant 0 : i32
    %c0_i32_1 = arith.constant 0 : i32
    return %c0_i32, %c0_i32_0 : i32, i32
  }
  func.func @transform_2(%arg0: i32) -> (i32, i32) {
    %c0_i32 = arith.constant 0 : i32
    %c0_i32_0 = arith.constant 0 : i32
    %c0_i32_1 = arith.constant 0 : i32
    return %c0_i32, %c0_i32_0 : i32, i32
  }
  func.func @transform_3(%arg0: i32) -> (i32, i32) {
    %c0_i32 = arith.constant 0 : i32
    %c0_i32_0 = arith.constant 0 : i32
    %c0_i32_1 = arith.constant 0 : i32
    return %c0_i32, %c0_i32_0 : i32, i32
  }
  func.func @transform_4(%arg0: i32) -> (i32, i32) {
    %c0_i32 = arith.constant 0 : i32
    %c0_i32_0 = arith.constant 0 : i32
    %c0_i32_1 = arith.constant 0 : i32
    return %c0_i32, %c0_i32_0 : i32, i32
  }
  func.func @transform_5(%arg0: i32) -> (i32, i32) {
    %c0_i32 = arith.constant 0 : i32
    %c0_i32_0 = arith.constant 0 : i32
    return %arg0, %c0_i32 : i32, i32
  }
}

</mosaic_0001>

<bundles_post_ra>
// kernel: net_forward.1
= control target key start
LH: loop header
LB: loop body
LE: loop exit
PB: predicated region body
PF: predicated region fallthrough
CT: control target
= control target key end

     0   :  { %10 = vsyncpa [#allocation3], 0  ;;  %s1546_s18 = smov [#allocation2]   ;;  %s1990_s0 = inlined_call_operand.vmem [shape: f32[16,784], index: 0, kind: input, shape index: {}]   ;;  %s1991_s1 = inlined_call_operand.vmem [shape: bf16[784,256], index: 1, kind: input, shape index: {}]   ;;  %s1992_s2 = inlined_call_operand.vmem [shape: bf16[256,128], index: 2, kind: input, shape index: {}]   ;;  %s1993_s3 = inlined_call_operand.hbm [shape: bf16[128,128], index: 3, kind: input, shape index: {}]   ;;  %s1994_s4 = inlined_call_operand.vmem [shape: f32[1,512], index: 4, kind: input, shape index: {}]   ;;  %s1995_s5 = inlined_call_operand.vmem [shape: bf16[16,128], index: 5, kind: output, shape index: {}]  }
   0x1   :  { %s22_s19 = sshll.u32 %s1546_s18, 4  ;;  %s1522_s22 = scalar_lea.hbm %s1993_s3, 1024  ;;  %s23_s19 = int_to_ptr.vmem [resolvable:$true] %s22_s19 }
   0x2   :  { %p1523_p0 = scmp.ne.s32.totalorder %s1993_s3, %s1522_s22  ;;  %p1526_p1 = scmp.lt.u32.totalorder %s1522_s22, %s1993_s3 }
   0x4   :  { %p1528_p2 = pnand %p1526_p1, %p1523_p0 }
   0x6   :  { %1531 = shalt.err (!%p1528_p2)
}
   0x7   :  { %s1532_s27 = scalar_lea.vmem %s23_s19, 1024  ;;  %p1537_p4 = scmp.lt.s32.totalorder %s23_s19, %s23_s19 }
   0x8   :  { %p1533_p3 = scmp.ne.s32.totalorder %s23_s19, %s1532_s27  ;;  %p1538_p5 = scmp.lt.s32.totalorder %s1532_s27, %s1532_s27 }
   0xa   :  { %p1539_p6 = por %p1538_p5, %p1537_p4 }
   0xc   :  { %p1540_p7 = pnand %p1539_p6, %p1533_p3 }
   0xe   :  { %1543 = shalt.err (!%p1540_p7)
}
   0xf   :  { %s1547_s28 = smov 64   ;;  %s1548_s29 = smov 4  }
  0x10   :  { %28 = dma.hbm_to_vmem [thread:$0]  %s1993_s3, 1024, %s23_s19, [#allocation3], %s1547_s28, %s1547_s28, %s1548_s29  }
  0x11   :  { %1544 = dma.done.wait [#allocation3], 1024  }
  0x12   :  { %1545 = vsyncadd [#allocation3], 4294966272  ;;  %v1351_v0 = vld [vmem:[%s1991_s1 + $0x104] ss:$8 sps:$4 sm:$0xff]   ;;  %v1353_v1 = vld [vmem:[%s1991_s1 + $0x100] ss:$8 sps:$4 sm:$0xff]  }
  0x13   :  { %705 = vmatprep.subr.bf16.mxu0 %v1351_v0  ;;  %v1354_v2 = vld [vmem:[%s1991_s1 + $0x114] ss:$8 sps:$4 sm:$0xff]   ;;  %v1356_v3 = vld [vmem:[%s1991_s1 + $0x110] ss:$8 sps:$4 sm:$0xff]   ;;  %v1357_v4 = vld [vmem:[%s1991_s1 + $0x124] ss:$8 sps:$4 sm:$0xff]  }
  0x14   :  { %706 = vmatpush1.bf16.msra.mxu0 %v1353_v1  ;;  %v1359_v5 = vld [vmem:[%s1991_s1 + $0x120] ss:$8 sps:$4 sm:$0xff]   ;;  %v1360_v6 = vld [vmem:[%s1991_s1 + $0x134] ss:$8 sps:$4 sm:$0xff]   ;;  %v1362_v7 = vld [vmem:[%s1991_s1 + $0x130] ss:$8 sps:$4 sm:$0xff]  }
  0x15   :  { %707 = vmatprep.subr.bf16.mxu0 %v1354_v2  ;;  %v1363_v8 = vld [vmem:[%s1991_s1 + $0x144] ss:$8 sps:$4 sm:$0xff]   ;;  %v1365_v9 = vld [vmem:[%s1991_s1 + $0x140] ss:$8 sps:$4 sm:$0xff]   ;;  %v1366_v10 = vld [vmem:[%s1991_s1 + $0x154] ss:$8 sps:$4 sm:$0xff]  }
  0x16   :  { %v1368_v11 = vld [vmem:[%s1991_s1 + $0x150] ss:$8 sps:$4 sm:$0xff]   ;;  %v1369_v12 = vld [vmem:[%s1991_s1 + $0x164] ss:$8 sps:$4 sm:$0xff]   ;;  %v1371_v16 = vld [vmem:[%s1991_s1 + $0x160] ss:$8 sps:$4 sm:$0xff]  }
  0x17   :  { %v41_v13 = vld [vmem:[%s1990_s0 + $0x18] sm:$0xff]  ;;  %v48_v14 = vld [vmem:[%s1990_s0 + $0x50] sm:$0xff]  ;;  %v1405_v18 = vld [vmem:[%s1991_s1 + $0x4] ss:$8 sps:$4 sm:$0xff]   ;;  %vm658_vm0 = vcmask 130048   ;;  %vm1551_vm1 = vmmov 0  }
  0x18   :  { %708 = vmatpush1.bf16.msra.mxu0 %v1356_v3  ;;  %v55_v15 = vpack.c.bf16 %v48_v14, %v41_v13  ;;  %v1372_v17 = vld [vmem:[%s1991_s1 + $0x174] ss:$8 sps:$4 sm:$0xff]   ;;  %v1374_v19 = vld [vmem:[%s1991_s1 + $0x170] ss:$8 sps:$4 sm:$0xff]   ;;  %v1375_v20 = vld [vmem:[%s1991_s1 + $0x184] ss:$8 sps:$4 sm:$0xff]   ;;  %662 = vmatprep.subr.bf16.mxu1 %v1405_v18 }
  0x19   :  { %709 = vmatprep.subr.bf16.mxu0 %v1357_v4  ;;  %v1410_v21 = vld [vmem:[%s1991_s1] ss:$8 sps:$4 sm:$0xff]   ;;  %v1411_v22 = vld [vmem:[%s1991_s1 + $0x14] ss:$8 sps:$4 sm:$0xff]   ;;  %v1416_v24 = vld [vmem:[%s1991_s1 + $0x10] ss:$8 sps:$4 sm:$0xff]  }
  0x1a   :  { %737 = vmatprep.mubr.bf16.mxu0 %v55_v15  ;;  %663 = vmatpush1.bf16.msra.mxu1 %v1410_v21  ;;  %v1377_v23 = vld [vmem:[%s1991_s1 + $0x180] ss:$8 sps:$4 sm:$0xff]   ;;  %v1417_v25 = vld [vmem:[%s1991_s1 + $0x24] ss:$8 sps:$4 sm:$0xff]   ;;  %v1378_v26 = vld [vmem:[%s1991_s1 + $0x194] ss:$8 sps:$4 sm:$0xff]  }
  0x1b   :  { %664 = vmatprep.subr.bf16.mxu1 %v1411_v22  ;;  %v1422_v27 = vld [vmem:[%s1991_s1 + $0x20] ss:$8 sps:$4 sm:$0xff]   ;;  %v1423_v28 = vld [vmem:[%s1991_s1 + $0x34] ss:$8 sps:$4 sm:$0xff]   ;;  %v1380_v29 = vld [vmem:[%s1991_s1 + $0x190] ss:$8 sps:$4 sm:$0xff]  }
  0x1c   :  { %710 = vmatpush1.bf16.msra.mxu0 %v1359_v5  ;;  %v1381_v30 = vld [vmem:[%s1991_s1 + $0x1a4] ss:$8 sps:$4 sm:$0xff]   ;;  %v1428_v31 = vld [vmem:[%s1991_s1 + $0x30] ss:$8 sps:$4 sm:$0xff]   ;;  %v1383_v33 = vld [vmem:[%s1991_s1 + $0x1a0] ss:$8 sps:$4 sm:$0xff]  }
  0x1d   :  { %711 = vmatprep.subr.bf16.mxu0 %v1360_v6  ;;  %v1429_v32 = vld [vmem:[%s1991_s1 + $0x44] ss:$8 sps:$4 sm:$0xff]   ;;  %v1384_v34 = vld [vmem:[%s1991_s1 + $0x1b4] ss:$8 sps:$4 sm:$0xff]   ;;  %v1434_v35 = vld [vmem:[%s1991_s1 + $0x40] ss:$8 sps:$4 sm:$0xff]  }
  0x1e   :  { %665 = vmatpush1.bf16.msra.mxu1 %v1416_v24  ;;  %v1435_v36 = vld [vmem:[%s1991_s1 + $0x54] ss:$8 sps:$4 sm:$0xff]   ;;  %v1386_v37 = vld [vmem:[%s1991_s1 + $0x1b0] ss:$8 sps:$4 sm:$0xff]   ;;  %v1387_v38 = vld [vmem:[%s1991_s1 + $0x1c4] ss:$8 sps:$4 sm:$0xff]  }
  0x1f   :  { %666 = vmatprep.subr.bf16.mxu1 %v1417_v25  ;;  %v1440_v39 = vld [vmem:[%s1991_s1 + $0x50] ss:$8 sps:$4 sm:$0xff]   ;;  %v1441_v40 = vld [vmem:[%s1991_s1 + $0x64] ss:$8 sps:$4 sm:$0xff]   ;;  %v1389_v41 = vld [vmem:[%s1991_s1 + $0x1c0] ss:$8 sps:$4 sm:$0xff]  }
  0x20   :  { %712 = vmatpush1.bf16.msra.mxu0 %v1362_v7  ;;  %v1390_v42 = vld [vmem:[%s1991_s1 + $0x1d4] ss:$8 sps:$4 sm:$0xff]   ;;  %v1446_v43 = vld [vmem:[%s1991_s1 + $0x60] ss:$8 sps:$4 sm:$0xff]   ;;  %v1392_v45 = vld [vmem:[%s1991_s1 + $0x1d0] ss:$8 sps:$4 sm:$0xff]  }
  0x21   :  { %713 = vmatprep.subr.bf16.mxu0 %v1363_v8  ;;  %v1447_v44 = vld [vmem:[%s1991_s1 + $0x74] ss:$8 sps:$4 sm:$0xff]   ;;  %v1393_v46 = vld [vmem:[%s1991_s1 + $0x1e4] ss:$8 sps:$4 sm:$0xff]   ;;  %v1452_v47 = vld [vmem:[%s1991_s1 + $0x70] ss:$8 sps:$4 sm:$0xff]  }
  0x22   :  { %667 = vmatpush1.bf16.msra.mxu1 %v1422_v27  ;;  %v1453_v48 = vld [vmem:[%s1991_s1 + $0x84] ss:$8 sps:$4 sm:$0xff]   ;;  %v1395_v49 = vld [vmem:[%s1991_s1 + $0x1e0] ss:$8 sps:$4 sm:$0xff]   ;;  %v1396_v50 = vld [vmem:[%s1991_s1 + $0x1f4] ss:$8 sps:$4 sm:$0xff]  }
  0x23   :  { %668 = vmatprep.subr.bf16.mxu1 %v1423_v28  ;;  %v1458_v51 = vld [vmem:[%s1991_s1 + $0x80] ss:$8 sps:$4 sm:$0xff]   ;;  %v1459_v52 = vld [vmem:[%s1991_s1 + $0x94] ss:$8 sps:$4 sm:$0xff]   ;;  %v1398_v53 = vld [vmem:[%s1991_s1 + $0x1f0] ss:$8 sps:$4 sm:$0xff]  }
  0x24   :  { %714 = vmatpush1.bf16.msra.mxu0 %v1365_v9  ;;  %v40_v54 = vld [vmem:[%s1990_s0 + $0x10] sm:$0xff]  ;;  %v47_v55 = vld [vmem:[%s1990_s0 + $0x48] sm:$0xff]  ;;  %v50_v62 = vld [vmem:[%s1990_s0 + $0x60] sm:$0xff] }
  0x25   :  { %715 = vmatprep.subr.bf16.mxu0 %v1366_v10  ;;  %v1401_v56 = vld [vmem:[%s1991_s1 + $0x204] ss:$8 sps:$4 sm:$0xff]   ;;  %v1464_v57 = vld [vmem:[%s1991_s1 + $0x90] ss:$8 sps:$4 sm:$0xff]   ;;  %v1399_v58 = vld [vmem:[%s1991_s1 + $0x200] ss:$8 sps:$4 sm:$0xff]   ;;  %v54_v59 = vpack.c.bf16 %v47_v55, %v40_v54 }
  0x26   :  { %669 = vmatpush1.bf16.msra.mxu1 %v1428_v31  ;;  %v1465_v60 = vld [vmem:[%s1991_s1 + $0xa4] ss:$8 sps:$4 sm:$0xff]   ;;  %v1404_v63 = vld [vmem:[%s1991_s1 + $0x214] ss:$8 sps:$4 sm:$0xff]   ;;  %v1470_v1 = vld [vmem:[%s1991_s1 + $0xa0] ss:$8 sps:$4 sm:$0xff]  }
  0x27   :  { %670 = vmatprep.subr.bf16.mxu1 %v1429_v32  ;;  %v43_v61 = vld [vmem:[%s1990_s0 + $0x28] sm:$0xff]  ;;  %v1471_v2 = vld [vmem:[%s1991_s1 + $0xb4] ss:$8 sps:$4 sm:$0xff]   ;;  %v1402_v3 = vld [vmem:[%s1991_s1 + $0x210] ss:$8 sps:$4 sm:$0xff]  }
  0x28   :  { %716 = vmatpush1.bf16.msra.mxu0 %v1368_v11  ;;  %v57_v0 = vpack.c.bf16 %v50_v62, %v43_v61  ;;  %v1409_v4 = vld [vmem:[%s1991_s1 + $0x224] ss:$8 sps:$4 sm:$0xff]   ;;  %v1476_v7 = vld [vmem:[%s1991_s1 + $0xb0] ss:$8 sps:$4 sm:$0xff]   ;;  %v1407_v10 = vld [vmem:[%s1991_s1 + $0x220] ss:$8 sps:$4 sm:$0xff]  }
  0x29   :  { %717 = vmatprep.subr.bf16.mxu0 %v1369_v12  ;;  %v39_v5 = vld [vmem:[%s1990_s0 + $0x8] sm:$0xff]  ;;  %v46_v6 = vld [vmem:[%s1990_s0 + $0x40] sm:$0xff]  ;;  %v1415_v11 = vld [vmem:[%s1991_s1 + $0x234] ss:$8 sps:$4 sm:$0xff]   ;;  %v1549_v61 = vmov 0  }
  0x2a   :  { %671 = vmatpush1.bf16.msra.mxu1 %v1434_v35  ;;  %v53_v8 = vpack.c.bf16 %v46_v6, %v39_v5  ;;  %v1477_v9 = vld [vmem:[%s1991_s1 + $0xc4] ss:$8 sps:$4 sm:$0xff]   ;;  %v1482_v12 = vld [vmem:[%s1991_s1 + $0xc0] ss:$8 sps:$4 sm:$0xff]   ;;  %v1483_v13 = vld [vmem:[%s1991_s1 + $0xd4] ss:$8 sps:$4 sm:$0xff]  }
  0x2b   :  { %672 = vmatprep.subr.bf16.mxu1 %v1435_v36  ;;  %v1413_v14 = vld [vmem:[%s1991_s1 + $0x230] ss:$8 sps:$4 sm:$0xff]   ;;  %v1421_v15 = vld [vmem:[%s1991_s1 + $0x244] ss:$8 sps:$4 sm:$0xff]   ;;  %v1427_v18 = vld [vmem:[%s1991_s1 + $0x254] ss:$8 sps:$4 sm:$0xff]  }
  0x2c   :  { %718 = vmatpush1.bf16.msra.mxu0 %v1371_v16  ;;  %694 = vmatprep.mubr.bf16.mxu1 %v53_v8  ;;  %v1419_v16 = vld [vmem:[%s1991_s1 + $0x240] ss:$8 sps:$4 sm:$0xff]   ;;  %v1495_v21 = vld [vmem:[%s1991_s1 + $0xf4] ss:$8 sps:$4 sm:$0xff]   ;;  %v1425_v22 = vld [vmem:[%s1991_s1 + $0x250] ss:$8 sps:$4 sm:$0xff]  }
  0x2d   :  { %719 = vmatprep.subr.bf16.mxu0 %v1372_v17  ;;  %v1488_v17 = vld [vmem:[%s1991_s1 + $0xd0] ss:$8 sps:$4 sm:$0xff]   ;;  %v38_v25 = vld [vmem:[%s1990_s0] sm:$0xff]  ;;  %v1500_v32 = vld [vmem:[%s1992_s2 + $0x48] sm:$0xff]   ;;  %v1550_v8 = vmov 0.0  }
  0x2e   :  { %673 = vmatpush1.bf16.msra.mxu1 %v1440_v39  ;;  %v1497_v24 = vld [vmem:[%s1991_s1 + $0xf0] ss:$8 sps:$4 sm:$0xff]   ;;  %v1498_v27 = vld [vmem:[%s1992_s2 + $0x40] sm:$0xff]   ;;  %v1501_v35 = vld [vmem:[%s1992_s2 + $0x8] sm:$0xff]  }
  0x2f   :  { %674 = vmatprep.subr.bf16.mxu1 %v1441_v40  ;;  %v1431_v28 = vld [vmem:[%s1991_s1 + $0x260] ss:$8 sps:$4 sm:$0xff]   ;;  %v1502_v36 = vld [vmem:[%s1992_s2 + $0x50] sm:$0xff]   ;;  %v1504_v40 = vld [vmem:[%s1992_s2 + $0x58] sm:$0xff]  }
  0x30   :  { %720 = vmatpush1.bf16.msra.mxu0 %v1374_v19  ;;  %v1489_v19 = vld [vmem:[%s1991_s1 + $0xe4] ss:$8 sps:$4 sm:$0xff]   ;;  %v1503_v39 = vld [vmem:[%s1992_s2 + $0x10] sm:$0xff]   ;;  %v1512_v6 = vld [vmem:[%s1992_s2 + $0x78] sm:$0xff]  }
  0x31   :  { %721 = vmatprep.subr.bf16.mxu0 %v1375_v20  ;;  %v1494_v20 = vld [vmem:[%s1991_s1 + $0xe0] ss:$8 sps:$4 sm:$0xff]   ;;  %v1487_v54 = vld [vmem:[%s1991_s1 + $0x2f4] ss:$8 sps:$4 sm:$0xff]   ;;  %v1485_v55 = vld [vmem:[%s1991_s1 + $0x2f0] ss:$8 sps:$4 sm:$0xff]  }
  0x32   :  { %675 = vmatpush1.bf16.msra.mxu1 %v1446_v43  ;;  %v1499_v31 = vld [vmem:[%s1992_s2] sm:$0xff]   ;;  %v1505_v43 = vld [vmem:[%s1992_s2 + $0x18] sm:$0xff]   ;;  %v44_v62 = vld [vmem:[%s1990_s0 + $0x30] sm:$0xff] }
  0x33   :  { %676 = vmatprep.subr.bf16.mxu1 %v1447_v44  ;;  %v1506_v44 = vld [vmem:[%s1992_s2 + $0x60] sm:$0xff]   ;;  %v1511_v5 = vld [vmem:[%s1992_s2 + $0x30] sm:$0xff]  }
  0x34   :  { %722 = vmatpush1.bf16.msra.mxu0 %v1377_v23  ;;  %v1433_v23 = vld [vmem:[%s1991_s1 + $0x264] ss:$8 sps:$4 sm:$0xff]  }
  0x35   :  { %723 = vmatprep.subr.bf16.mxu0 %v1378_v26  ;;  %v45_v26 = vld [vmem:[%s1990_s0 + $0x38] sm:$0xff] }
  0x36   :  { %677 = vmatpush1.bf16.msra.mxu1 %v1452_v47  ;;  %v1461_v47 = vld [vmem:[%s1991_s1 + $0x2b0] ss:$8 sps:$4 sm:$0xff]  }
  0x37   :  { %678 = vmatprep.subr.bf16.mxu1 %v1453_v48  ;;  %v1469_v48 = vld [vmem:[%s1991_s1 + $0x2c4] ss:$8 sps:$4 sm:$0xff]  }
  0x38   :  { %724 = vmatpush1.bf16.msra.mxu0 %v1380_v29  ;;  %v1439_v29 = vld [vmem:[%s1991_s1 + $0x274] ss:$8 sps:$4 sm:$0xff]  }
  0x39   :  { %725 = vmatprep.subr.bf16.mxu0 %v1381_v30  ;;  %v52_v30 = vpack.c.bf16 %v45_v26, %v38_v25 }
  0x3a   :  { %679 = vmatpush1.bf16.msra.mxu1 %v1458_v51  ;;  %v1473_v51 = vld [vmem:[%s1991_s1 + $0x2d0] ss:$8 sps:$4 sm:$0xff]  }
  0x3b   :  { %680 = vmatprep.subr.bf16.mxu1 %v1459_v52  ;;  %v1481_v52 = vld [vmem:[%s1991_s1 + $0x2e4] ss:$8 sps:$4 sm:$0xff]  }
  0x3c   :  { %726 = vmatpush1.bf16.msra.mxu0 %v1383_v33  ;;  %v1437_v33 = vld [vmem:[%s1991_s1 + $0x270] ss:$8 sps:$4 sm:$0xff]  }
  0x3d   :  { %727 = vmatprep.subr.bf16.mxu0 %v1384_v34  ;;  %v1445_v34 = vld [vmem:[%s1991_s1 + $0x284] ss:$8 sps:$4 sm:$0xff]  }
  0x3e   :  { %681 = vmatpush1.bf16.msra.mxu1 %v1464_v57  ;;  %v49_v57 = vld [vmem:[%s1990_s0 + $0x58] sm:$0xff] }
  0x3f   :  { %682 = vmatprep.subr.bf16.mxu1 %v1465_v60  ;;  %v1491_v60 = vld [vmem:[%s1991_s1 + $0x300] ss:$8 sps:$4 sm:$0xff]  }
  0x40   :  { %728 = vmatpush1.bf16.msra.mxu0 %v1386_v37  ;;  %v1443_v37 = vld [vmem:[%s1991_s1 + $0x280] ss:$8 sps:$4 sm:$0xff]  }
  0x41   :  { %729 = vmatprep.subr.bf16.mxu0 %v1387_v38  ;;  %v1451_v38 = vld [vmem:[%s1991_s1 + $0x294] ss:$8 sps:$4 sm:$0xff]  }
  0x42   :  { %683 = vmatpush1.bf16.msra.mxu1 %v1470_v1  ;;  %v1507_v1 = vld [vmem:[%s1992_s2 + $0x20] sm:$0xff]  }
  0x43   :  { %684 = vmatprep.subr.bf16.mxu1 %v1471_v2  ;;  %v1508_v2 = vld [vmem:[%s1992_s2 + $0x68] sm:$0xff]  }
  0x44   :  { %730 = vmatpush1.bf16.msra.mxu0 %v1389_v41  ;;  %v1449_v41 = vld [vmem:[%s1991_s1 + $0x290] ss:$8 sps:$4 sm:$0xff]  }
  0x45   :  { %731 = vmatprep.subr.bf16.mxu0 %v1390_v42  ;;  %v1457_v42 = vld [vmem:[%s1991_s1 + $0x2a4] ss:$8 sps:$4 sm:$0xff]  }
  0x46   :  { %685 = vmatpush1.bf16.msra.mxu1 %v1476_v7  ;;  %v1513_v7 = vld [vmem:[%s1992_s2 + $0x38] sm:$0xff]  }
  0x47   :  { %686 = vmatprep.subr.bf16.mxu1 %v1477_v9 }
  0x48   :  { %732 = vmatpush1.bf16.msra.mxu0 %v1392_v45  ;;  %v1455_v45 = vld [vmem:[%s1991_s1 + $0x2a0] ss:$8 sps:$4 sm:$0xff]  }
  0x49   :  { %733 = vmatprep.subr.bf16.mxu0 %v1393_v46  ;;  %v1463_v46 = vld [vmem:[%s1991_s1 + $0x2b4] ss:$8 sps:$4 sm:$0xff]  }
  0x4a   :  { %687 = vmatpush1.bf16.msra.mxu1 %v1482_v12 }
  0x4b   :  { %688 = vmatprep.subr.bf16.mxu1 %v1483_v13  ;;  %v158_v13 = vlaneseq }
  0x4c   :  { %734 = vmatpush1.bf16.msra.mxu0 %v1395_v49  ;;  %v1467_v49 = vld [vmem:[%s1991_s1 + $0x2c0] ss:$8 sps:$4 sm:$0xff]  }
  0x4d   :  { %735 = vmatprep.subr.bf16.mxu0 %v1396_v50  ;;  %v1475_v50 = vld [vmem:[%s1991_s1 + $0x2d4] ss:$8 sps:$4 sm:$0xff]  }
  0x4e   :  { %689 = vmatpush1.bf16.msra.mxu1 %v1488_v17 }
  0x4f   :  { %690 = vmatprep.subr.bf16.mxu1 %v1489_v19 }
  0x50   :  { %736 = vmatpush1.bf16.msra.mxu0 %v1398_v53  ;;  %v1479_v53 = vld [vmem:[%s1991_s1 + $0x2e0] ss:$8 sps:$4 sm:$0xff]  }
  0x51   :  { %748 = vmatprep.subr.bf16.mxu0 %v1401_v56  ;;  %v42_v56 = vld [vmem:[%s1990_s0 + $0x20] sm:$0xff] }
  0x52   :  { %691 = vmatpush1.bf16.msra.mxu1 %v1494_v20 }
  0x53   :  { %738 = vmatmul.mubr.bf16.vlgmr.msra.gmra.mrb[0].mxu0 %v54_v59  ;;  %692 = vmatprep.subr.bf16.mxu1 %v1495_v21  ;;  %v56_v59 = vpack.c.bf16 %v49_v57, %v42_v56 }
  0x54   :  { %749 = vmatpush1.bf16.msra.mxu0 %v1399_v58  ;;  %780 = vmatprep.mubr.bf16.mxu0 %v57_v0  ;;  %v1493_v58 = vld [vmem:[%s1991_s1 + $0x304] ss:$8 sps:$4 sm:$0xff]  }
  0x55   :  { %750 = vmatprep.subr.bf16.mxu0 %v1404_v63  ;;  %v51_v63 = vld [vmem:[%s1990_s0 + $0x68] sm:$0xff] }
  0x56   :  { %693 = vmatpush1.bf16.msra.mxu1 %v1497_v24  ;;  %v58_v0 = vpack.c.bf16 %v51_v63, %v44_v62 }
  0x57   :  { %1278 = vmatprep.subr.bf16.mxu1 %v1498_v27 }
  0x58   :  { %751 = vmatpush1.bf16.msra.mxu0 %v1402_v3  ;;  %v1509_v3 = vld [vmem:[%s1992_s2 + $0x28] sm:$0xff]  }
  0x59   :  { %752 = vmatprep.subr.bf16.mxu0 %v1409_v4  ;;  %695 = vmatmul.mubr.bf16.vlgmr.msra.gmra.mrb[0].mxu1 %v52_v30  ;;  %v1510_v4 = vld [vmem:[%s1992_s2 + $0x70] sm:$0xff]  }
  0x5a   :  { %1279 = vmatpush3.bf16.msra.mxu1 %v1499_v31 }
  0x5b   :  { %1280 = vmatprep.subr.bf16.mxu1 %v1500_v32 }
  0x5c   :  { %753 = vmatpush1.bf16.msra.mxu0 %v1407_v10 }
  0x5d   :  { %754 = vmatprep.subr.bf16.mxu0 %v1415_v11 }
  0x5e   :  { %1281 = vmatpush3.bf16.msra.mxu1 %v1501_v35 }
  0x5f   :  { %1282 = vmatprep.subr.bf16.mxu1 %v1502_v36 }
  0x60   :  { %755 = vmatpush1.bf16.msra.mxu0 %v1413_v14  ;;  %v159_v14 = vshrl.u32 %v158_v13, 7 }
  0x61   :  { %756 = vmatprep.subr.bf16.mxu0 %v1421_v15 }
  0x62   :  { %1283 = vmatpush3.bf16.msra.mxu1 %v1503_v39  ;;  %v160_v15 = vsub.s32 0, %v159_v14  ;;  %v164_v17 = vsub.s32 1, %v159_v14  ;;  %v1515_v39 = vld [vmem:[#allocation2 + $0x8] sm:$0xff]  }
  0x63   :  { %1284 = vmatprep.subr.bf16.mxu1 %v1504_v40  ;;  %v1516_v40 = vld [vmem:[#allocation2 + $0x10] sm:$0xff]  }
  0x64   :  { %757 = vmatpush1.bf16.msra.mxu0 %v1419_v16  ;;  %v35_v16 = vld [vmem:[%s1994_s4] sm:$0x3] }
  0x65   :  { %758 = vmatprep.subr.bf16.mxu0 %v1427_v18  ;;  %v161_v18 = vrot.slane %v35_v16, %v160_v15  ;;  %v165_v19 = vrot.slane %v35_v16, %v164_v17 }
  0x66   :  { %1285 = vmatpush3.bf16.msra.mxu1 %v1505_v43  ;;  %v1519_v43 = vld [vmem:[#allocation2 + $0x28] sm:$0xff]  }
  0x67   :  { %1286 = vmatprep.subr.bf16.mxu1 %v1506_v44  ;;  %v1520_v44 = vld [vmem:[#allocation2 + $0x30] sm:$0xff]  }
  0x68   :  { %759 = vmatpush1.bf16.msra.mxu0 %v1425_v22 }
  0x69   :  { %760 = vmatprep.subr.bf16.mxu0 %v1433_v23 }
  0x6a   :  { %1287 = vmatpush3.bf16.msra.mxu1 %v1507_v1 }
  0x6b   :  { %1288 = vmatprep.subr.bf16.mxu1 %v1508_v2 }
  0x6c   :  { %761 = vmatpush1.bf16.msra.mxu0 %v1431_v28 }
  0x6d   :  { %762 = vmatprep.subr.bf16.mxu0 %v1439_v29 }
  0x6e   :  { %1289 = vmatpush3.bf16.msra.mxu1 %v1509_v3 }
  0x6f   :  { %1290 = vmatprep.subr.bf16.mxu1 %v1510_v4 }
  0x70   :  { %763 = vmatpush1.bf16.msra.mxu0 %v1437_v33 }
  0x71   :  { %764 = vmatprep.subr.bf16.mxu0 %v1445_v34 }
  0x72   :  { %1291 = vmatpush3.bf16.msra.mxu1 %v1511_v5 }
  0x73   :  { %1292 = vmatprep.subr.bf16.mxu1 %v1512_v6 }
  0x74   :  { %765 = vmatpush1.bf16.msra.mxu0 %v1443_v37 }
  0x75   :  { %766 = vmatprep.subr.bf16.mxu0 %v1451_v38  ;;  %v1514_v38 = vld [vmem:[#allocation2] sm:$0xff]  }
  0x76   :  { %1293 = vmatpush3.bf16.msra.mxu1 %v1513_v7 }
  0x77   :  { %1309 = vmatprep.subr.bf16.mxu1 %v1550_v8 }
  0x78   :  { %767 = vmatpush1.bf16.msra.mxu0 %v1449_v41  ;;  %v1517_v41 = vld [vmem:[#allocation2 + $0x18] sm:$0xff]  }
  0x79   :  { %768 = vmatprep.subr.bf16.mxu0 %v1457_v42  ;;  %v1518_v42 = vld [vmem:[#allocation2 + $0x20] sm:$0xff]  }
  0x7c   :  { %769 = vmatpush1.bf16.msra.mxu0 %v1455_v45  ;;  %v1521_v45 = vld [vmem:[#allocation2 + $0x38] sm:$0xff]  }
  0x7d   :  { %770 = vmatprep.subr.bf16.mxu0 %v1463_v46 }
  0x80   :  { %771 = vmatpush1.bf16.msra.mxu0 %v1461_v47  ;;  %v1243_v47 = vld [vmem:[%s1994_s4 + $0x2] ss:$0 sm:$0xff] }
  0x81   :  { %772 = vmatprep.subr.bf16.mxu0 %v1469_v48 }
  0x84   :  { %773 = vmatpush1.bf16.msra.mxu0 %v1467_v49 }
  0x85   :  { %774 = vmatprep.subr.bf16.mxu0 %v1475_v50 }
  0x88   :  { %775 = vmatpush1.bf16.msra.mxu0 %v1473_v51 }
  0x89   :  { %776 = vmatprep.subr.bf16.mxu0 %v1481_v52 }
  0x8c   :  { %777 = vmatpush1.bf16.msra.mxu0 %v1479_v53 }
  0x8d   :  { %778 = vmatprep.subr.bf16.mxu0 %v1487_v54 }
  0x90   :  { %779 = vmatpush1.bf16.msra.mxu0 %v1485_v55 }
  0x91   :  { %791 = vmatprep.subr.bf16.mxu0 %v1493_v58  ;;  %v1260_v58 = vld [vmem:[%s1994_s4 + $0x3] ss:$0 sm:$0xff] }
  0x93   :  { %781 = vmatmul.mubr.bf16.vlgmr.msra.gmra.mrb[0].mxu0 %v56_v59 }
  0x94   :  { %792 = vmatpush1.bf16.msra.mxu0 %v1491_v60  ;;  %823 = vmatprep.mubr.bf16.mxu0 %v1549_v61 }
  0x9f   :  { %1242 = vmatmul.mubr.msk.bf16.vlgmr.msra.gmra.mrb[0].mxu0 %vm658_vm0, %v58_v0 }
 0x12c   :  { %v696_v9 = vpop.f32.mrb[0].mxu1 }
 0x12d   :  { %v698_v10 = vpop.f32.mrb[1].mxu1  ;;  %v697_v20 = vadd.f32 %v696_v9, %v161_v18 }
 0x12e   :  { %v700_v11 = vpop.f32.mrb[2].mxu1  ;;  %v699_v21 = vadd.f32 %v698_v10, %v165_v19 }
 0x12f   :  { %v702_v12 = vpop.f32.mrb[3].mxu1  ;;  %v701_v23 = vadd.f32 %v700_v11, %v161_v18 }
 0x130   :  { %v703_v26 = vadd.f32 %v702_v12, %v165_v19 }
 0x172   :  { %v825_v22 = vpop.f32.mrb[0].mxu0 }
 0x173   :  { %v1330_v24 = vadd.f32 %v825_v22, %v697_v20  ;;  %v827_v25 = vpop.f32.mrb[1].mxu0 }
 0x174   :  { %v1332_v27 = vadd.f32 %v827_v25, %v699_v21  ;;  %v829_v28 = vpop.f32.mrb[2].mxu0 }
 0x175   :  { %v1334_v29 = vadd.f32 %v829_v28, %v701_v23  ;;  %v831_v30 = vpop.f32.mrb[3].mxu0  ;;  %v834_v32 = vmax.f32 %v1330_v24, 0.0 }
 0x176   :  { %v1336_v31 = vadd.f32 %v831_v30, %v703_v26  ;;  %v835_v34 = vmax.f32 %v1332_v27, 0.0 }
 0x177   :  { %v836_v33 = vmax.f32 %v1334_v29, 0.0 }
 0x178   :  { %v837_v35 = vmax.f32 %v1336_v31, 0.0 }
 0x179   :  { %v838_v36 = vpack.c.bf16 %v836_v33, %v834_v32 }
 0x17a   :  { %v839_v37 = vpack.c.bf16 %v837_v35, %v835_v34 }
 0x17c   :  { %1006 = vmatprep.mubr.bf16.mxu1 %v839_v37 }
 0x17d   :  { %1007 = vmatmul.mubr.bf16.vlgmr.msra.gmra.mrb[4].mxu1 %v838_v36 }
 0x17e   :  { %1310 = vmatpush3.bf16.msra.mxu1 %v1514_v38  ;;  %1325 = vmatprep.mubr.msk.bf16.mxu1 %vm1551_vm1, %v1550_v8 }
 0x17f   :  { %1311 = vmatprep.subr.bf16.mxu1 %v1550_v8 }
 0x182   :  { %1312 = vmatpush3.bf16.msra.mxu1 %v1515_v39 }
 0x183   :  { %1313 = vmatprep.subr.bf16.mxu1 %v1550_v8 }
 0x186   :  { %1314 = vmatpush3.bf16.msra.mxu1 %v1516_v40 }
 0x187   :  { %1315 = vmatprep.subr.bf16.mxu1 %v1550_v8 }
 0x18a   :  { %1316 = vmatpush3.bf16.msra.mxu1 %v1517_v41 }
 0x18b   :  { %1317 = vmatprep.subr.bf16.mxu1 %v1550_v8 }
 0x18e   :  { %1318 = vmatpush3.bf16.msra.mxu1 %v1518_v42 }
 0x18f   :  { %1319 = vmatprep.subr.bf16.mxu1 %v1550_v8 }
 0x192   :  { %1320 = vmatpush3.bf16.msra.mxu1 %v1519_v43 }
 0x193   :  { %1321 = vmatprep.subr.bf16.mxu1 %v1550_v8 }
 0x196   :  { %1322 = vmatpush3.bf16.msra.mxu1 %v1520_v44 }
 0x197   :  { %1323 = vmatprep.subr.bf16.mxu1 %v1550_v8 }
 0x19a   :  { %1324 = vmatpush3.bf16.msra.mxu1 %v1521_v45 }
 0x250   :  { %v1294_v46 = vpop.f32.mrb[4].mxu1 }
 0x251   :  { %v1295_v48 = vpop.f32.mrb[5].mxu1 }
 0x252   :  { %v1296_v49 = vadd.f32 %v1295_v48, %v1294_v46  ;;  %v1297_v50 = vpop.f32.mrb[6].mxu1 }
 0x253   :  { %v1298_v51 = vpop.f32.mrb[7].mxu1 }
 0x254   :  { %v1009_v52 = vadd.f32 %v1296_v49, %v1243_v47  ;;  %v1299_v53 = vadd.f32 %v1298_v51, %v1297_v50 }
 0x256   :  { %v1012_v54 = vadd.f32 %v1299_v53, %v1243_v47  ;;  %v1015_v55 = vmax.f32 %v1009_v52, 0.0 }
 0x258   :  { %v1016_v56 = vmax.f32 %v1012_v54, 0.0 }
 0x25a   :  { %v1017_v57 = vpack.c.bf16 %v1016_v56, %v1015_v55 }
 0x25c   :  { %1326 = vmatmul.mubr.bf16.vlgmr.msra.gmra.mrb[8].mxu1 %v1017_v57 }
 0x32f   :  { %v1122_v59 = vpop.f32.mrb[8].mxu1 }
 0x330   :  { %v1327_v60 = vpop.f32.mrb[9].mxu1  ;;  %v1123_v62 = vadd.f32 %v1260_v58, %v1122_v59 }
 0x331   :  { %v1125_v61 = vpop.f32.mrb[10].mxu1 }
 0x332   :  { %v1126_v63 = vadd.f32 %v1260_v58, %v1125_v61  ;;  %v1328_v0 = vpop.f32.mrb[11].mxu1 }
 0x334   :  { %v1276_v1 = vpack.c.bf16 %v1126_v63, %v1123_v62 }
 0x336   :  { %1277 = vst [vmem:[%s1995_s5] sm:$0xff] %v1276_v1  }
 0x337   :  { %1143 = vsyncpa [#allocation3], 1 }

</bundles_post_ra>
